<compile_context>
chip_gen: v7x
topology: tpu7x:2x2x1
jax: 0.10.0
libtpu: 0.0.40
codegen_flags: <defaults>
</compile_context>

<pallas_src>
import functools

import jax
import jax.numpy as jnp
from jax.experimental import pallas as pl
from jax.experimental.pallas import tpu as pltpu

STATE_DIM = 33
ACTION_DIM = 4
HIDDEN_DIMS = (400, 300)
MAX_ACTION = 1.0
LANE = 128


def _round_up(x, m):
    return (x + m - 1) // m * m


def ddpg_actor_kernel(x_ref, w1_ref, b1_ref, w2_ref, b2_ref, w3_ref, b3_ref,
                      o_ref, *, max_action):
    # In-kernel f32 -> bf16 cast of the state tile (VPU, hidden under weight DMA).
    x = x_ref[...].astype(jnp.bfloat16)
    # Layer 1: Linear (bf16 MXU inputs, f32 accumulation) + bias + ReLU in f32.
    h1 = jnp.dot(x, w1_ref[...], preferred_element_type=jnp.float32)
    h1 = jnp.maximum(h1 + b1_ref[...], 0.0)
    # Layer 2: Linear + ReLU (re-cast activation to bf16 only to feed the MXU).
    h2 = jnp.dot(h1.astype(jnp.bfloat16), w2_ref[...],
                 preferred_element_type=jnp.float32)
    h2 = jnp.maximum(h2 + b2_ref[...], 0.0)
    # Layer 3: Linear + Tanh (+ optional max_action scale, elided when == 1.0).
    out = jnp.dot(h2.astype(jnp.bfloat16), w3_ref[...],
                  preferred_element_type=jnp.float32)
    out = jnp.tanh(out + b3_ref[...])
    if max_action != 1.0:
        out = max_action * out
    o_ref[...] = out.astype(o_ref.dtype)


def prepare_params(params):
    """One-time conversion (do at init, NOT per forward call):
    weights -> bf16 in (in, out) layout, biases -> f32 row vectors.
    Also builds lane-dense copies of the final layer (output dim zero-padded
    4 -> 128). The padded bias columns are exactly 0 (tanh(0) = 0) and the
    wrapper slices [:, :action_dim], so nothing leaks into returned actions."""
    (w1, b1), (w2, b2), (w3, b3) = params
    a = w3.shape[1]
    w3_bf = w3.astype(jnp.bfloat16)
    b3_f32 = b3.reshape(1, -1).astype(jnp.float32)
    # NOTE(accuracy): W3 ~ U(-3e-3, 3e-3); bf16 quantization of it is ~0.4% rel
    # error on the last layer and is covered by the test tolerances below. Keep
    # W3 in f32 here (only ~1.2 KB) if that gap ever matters.
    a_pad = _round_up(a, LANE)
    w3_pad = jnp.zeros((w3.shape[0], a_pad), jnp.bfloat16).at[:, :a].set(w3_bf)
    b3_pad = jnp.zeros((1, a_pad), jnp.float32).at[:, :a].set(b3_f32)
    return {
        "w1": w1.astype(jnp.bfloat16), "b1": b1.reshape(1, -1).astype(jnp.float32),
        "w2": w2.astype(jnp.bfloat16), "b2": b2.reshape(1, -1).astype(jnp.float32),
        "w3": w3_bf, "b3": b3_f32,                 # narrow (tiny-batch) path
        "w3_pad": w3_pad, "b3_pad": b3_pad,        # lane-dense (throughput) path
        "action_dim": a,
    }


def ddpg_actor_forward(state, prepared, max_action=MAX_ACTION, block_m=1024,
                       lane_dense_min_batch=256):
    """state: (B, STATE_DIM) float32. Returns (B, ACTION_DIM) float32."""
    B, S = state.shape
    w1, b1 = prepared["w1"], prepared["b1"]
    w2, b2 = prepared["w2"], prepared["b2"]
    act_dim = prepared["action_dim"]

    # Lane-dense output (unmasked 128-wide stores + wrapper slice) only pays for
    # throughput batches; tiny batches keep the direct 4-wide output with zero
    # extra wrapper ops and ~74 KB less resident-W3 DMA.
    lane_dense = B >= lane_dense_min_batch
    if lane_dense:
        w3, b3 = prepared["w3_pad"], prepared["b3_pad"]
    else:
        w3, b3 = prepared["w3"], prepared["b3"]

    H1, H2, A_out = w1.shape[1], w2.shape[1], w3.shape[1]

    # Batch tile: multiple of 8 sublanes, capped at block_m, and sized so any
    # B > 8 yields >= 2 grid programs (lets the "parallel" axis shard across
    # v7x's two TensorCores). No wrapper padding: the partial last block is
    # clipped by Pallas on writeback.
    TM = max(8, min(block_m, _round_up(pl.cdiv(B, 2), 8)))
    grid_m = pl.cdiv(B, TM)

    kernel = functools.partial(ddpg_actor_kernel, max_action=float(max_action))

    def resident(shape):
        # Constant index_map: weights/biases are fetched once and stay
        # VMEM-resident across all batch tiles.
        return pl.BlockSpec(shape, lambda i: (0, 0))

    weight_bytes = (w1.size + w2.size + w3.size) * 2 \
        + (b1.size + b2.size + b3.size) * 4
    cost = pl.CostEstimate(
        flops=2 * B * (S * H1 + H1 * H2 + H2 * A_out),
        transcendentals=B * A_out,
        bytes_accessed=weight_bytes + B * S * 4 + B * A_out * 4,
    )

    out = pl.pallas_call(
        kernel,
        out_shape=jax.ShapeDtypeStruct((B, A_out), jnp.float32),
        grid=(grid_m,),
        in_specs=[
            pl.BlockSpec((TM, S), lambda i: (i, 0)),     # x: tiled over batch
            resident(w1.shape), resident(b1.shape),      # params: VMEM-resident
            resident(w2.shape), resident(b2.shape),
            resident(w3.shape), resident(b3.shape),
        ],
        out_specs=pl.BlockSpec((TM, A_out), lambda i: (i, 0)),
        compiler_params=pltpu.CompilerParams(dimension_semantics=("parallel",)),
        cost_estimate=cost,
    )(state, w1, b1, w2, b2, w3, b3)

    if lane_dense:
        out = out[:, :act_dim]
    return out


def init_params(key):
    """Deterministic init mirroring the PyTorch module's reset_parameter():
    hidden-layer weights ~ U(-1/sqrt(fan), 1/sqrt(fan)) with fan = weight.size()[0]
    (== out_features, replicating the original quirk), final weights ~ U(-3e-3, 3e-3),
    biases use the PyTorch Linear default U(-1/sqrt(in_features), 1/sqrt(in_features))."""
    dims = (STATE_DIM,) + HIDDEN_DIMS + (ACTION_DIM,)
    keys = jax.random.split(key, 2 * (len(dims) - 1))
    params = []
    for i in range(len(dims) - 1):
        d_in, d_out = dims[i], dims[i + 1]
        wkey, bkey = keys[2 * i], keys[2 * i + 1]
        if i < len(dims) - 2:
            lim_w = 1.0 / jnp.sqrt(jnp.float32(d_out))
        else:
            lim_w = 3e-3
        lim_b = 1.0 / jnp.sqrt(jnp.float32(d_in))
        # Stored as (in, out) so forward is x @ W + b.
        w = jax.random.uniform(wkey, (d_in, d_out), jnp.float32, -lim_w, lim_w)
        b = jax.random.uniform(bkey, (d_out,), jnp.float32, -lim_b, lim_b)
        params.append((w, b))
    return params


def reference_forward(state, params, max_action=MAX_ACTION):
    """Full-f32 reference (module semantics)."""
    (w1, b1), (w2, b2), (w3, b3) = params
    h = jnp.maximum(state @ w1 + b1, 0.0)
    h = jnp.maximum(h @ w2 + b2, 0.0)
    return max_action * jnp.tanh(h @ w3 + b3)


def reference_forward_bf16(state, prepared, max_action=MAX_ACTION):
    """Reference that mirrors the kernel's dtype strategy (bf16 MXU inputs, f32 acc)."""
    w1, b1 = prepared["w1"], prepared["b1"]
    w2, b2 = prepared["w2"], prepared["b2"]
    w3, b3 = prepared["w3"], prepared["b3"]
    h = jnp.dot(state.astype(jnp.bfloat16), w1, preferred_element_type=jnp.float32)
    h = jnp.maximum(h + b1, 0.0)
    h = jnp.dot(h.astype(jnp.bfloat16), w2, preferred_element_type=jnp.float32)
    h = jnp.maximum(h + b2, 0.0)
    out = jnp.dot(h.astype(jnp.bfloat16), w3, preferred_element_type=jnp.float32)
    return max_action * jnp.tanh(out + b3)


if __name__ == "__main__":
    key = jax.random.PRNGKey(0)
    pkey, xkey, xkey2 = jax.random.split(key, 3)
    params = init_params(pkey)
    prepared = prepare_params(params)   # one-time cast/layout, outside the hot path

    # Small-shape test (B=2): narrow 4-wide output path, single grid program,
    # partial input block (no wrapper padding/slicing).
    B = 2
    state = jax.random.normal(xkey, (B, STATE_DIM), jnp.float32)
    out = jax.block_until_ready(ddpg_actor_forward(state, prepared, MAX_ACTION))
    assert out.shape == (B, ACTION_DIM)
    assert jnp.allclose(out, reference_forward_bf16(state, prepared, MAX_ACTION),
                        atol=5e-3, rtol=5e-3), "small-B mismatch vs bf16 reference"
    assert jnp.allclose(out, reference_forward(state, params, MAX_ACTION),
                        atol=2e-2, rtol=2e-2), "small-B mismatch vs f32 reference"

    # Throughput-shape sanity check (B=1000): lane-dense output, partial last
    # block, >= 2 grid programs (exercises the v7x megacore path).
    B2 = 1000
    state2 = jax.random.normal(xkey2, (B2, STATE_DIM), jnp.float32)
    out2 = jax.block_until_ready(ddpg_actor_forward(state2, prepared, MAX_ACTION))
    assert out2.shape == (B2, ACTION_DIM)
    assert jnp.allclose(out2, reference_forward_bf16(state2, prepared, MAX_ACTION),
                        atol=5e-3, rtol=5e-3), "large-B mismatch vs bf16 reference"
    assert jnp.allclose(out2, reference_forward(state2, params, MAX_ACTION),
                        atol=2e-2, rtol=2e-2), "large-B mismatch vs f32 reference"

    print("KERNEL_OK")
</pallas_src>

<mosaic_0001>
module attributes {stable_mosaic.version = 11 : i64} {
  func.func @ddpg_actor_kernel(%arg0: i32, %arg1: memref<8x33xf32, #tpu.memory_space<vmem>>, %arg2: memref<33x400xbf16, #tpu.memory_space<vmem>>, %arg3: memref<1x400xf32, #tpu.memory_space<vmem>>, %arg4: memref<400x300xbf16, #tpu.memory_space<vmem>>, %arg5: memref<1x300xf32, #tpu.memory_space<vmem>>, %arg6: memref<300x4xbf16, #tpu.memory_space<vmem>>, %arg7: memref<1x4xf32, #tpu.memory_space<vmem>>, %arg8: memref<8x4xf32, #tpu.memory_space<vmem>>) attributes {dimension_semantics = [#tpu.dimension_semantics<parallel>], iteration_bounds = array<i64: 1>, scalar_prefetch = 0 : i64, scratch_operands = 0 : i64, tpu.core_type = #tpu.core_type<tc>, window_params = [{transform_indices = @transform_0, window_bounds = array<i64: 8, 33>}, {pipeline_mode = #tpu.pipeline_mode<synchronous>, transform_indices = @transform_1, window_bounds = array<i64: 33, 400>}, {pipeline_mode = #tpu.pipeline_mode<synchronous>, transform_indices = @transform_2, window_bounds = array<i64: 1, 400>}, {pipeline_mode = #tpu.pipeline_mode<synchronous>, transform_indices = @transform_3, window_bounds = array<i64: 400, 300>}, {pipeline_mode = #tpu.pipeline_mode<synchronous>, transform_indices = @transform_4, window_bounds = array<i64: 1, 300>}, {pipeline_mode = #tpu.pipeline_mode<synchronous>, transform_indices = @transform_5, window_bounds = array<i64: 300, 4>}, {pipeline_mode = #tpu.pipeline_mode<synchronous>, transform_indices = @transform_6, window_bounds = array<i64: 1, 4>}, {transform_indices = @transform_7, window_bounds = array<i64: 8, 4>}]} {
    %c0 = arith.constant 0 : index
    %c0_0 = arith.constant 0 : index
    %0 = vector.load %arg1[%c0, %c0_0] : memref<8x33xf32, #tpu.memory_space<vmem>>, vector<8x33xf32>
    %1 = arith.truncf %0 : vector<8x33xf32> to vector<8x33xbf16>
    %c0_1 = arith.constant 0 : index
    %c0_2 = arith.constant 0 : index
    %2 = vector.load %arg2[%c0_1, %c0_2] : memref<33x400xbf16, #tpu.memory_space<vmem>>, vector<33x400xbf16>
    %cst = arith.constant dense<0.000000e+00> : vector<8x400xf32>
    %3 = tpu.matmul %1, %2, %cst {dimension_numbers = #tpu.dot_dimension_numbers<[1], [0], [0], [1], [0, 0, 1, 1], [], []>} : vector<8x33xbf16>, vector<33x400xbf16>, vector<8x400xf32> -> vector<8x400xf32>
    %c0_3 = arith.constant 0 : index
    %c0_4 = arith.constant 0 : index
    %4 = vector.load %arg3[%c0_3, %c0_4] : memref<1x400xf32, #tpu.memory_space<vmem>>, vector<1x400xf32>
    %5 = vector.broadcast %4 : vector<1x400xf32> to vector<8x400xf32>
    %6 = arith.addf %3, %5 : vector<8x400xf32>
    %cst_5 = arith.constant 0.000000e+00 : f32
    %7 = vector.broadcast %cst_5 : f32 to vector<8x400xf32>
    %8 = arith.maximumf %6, %7 : vector<8x400xf32>
    %9 = arith.truncf %8 : vector<8x400xf32> to vector<8x400xbf16>
    %c0_6 = arith.constant 0 : index
    %c0_7 = arith.constant 0 : index
    %10 = vector.load %arg4[%c0_6, %c0_7] : memref<400x300xbf16, #tpu.memory_space<vmem>>, vector<400x300xbf16>
    %cst_8 = arith.constant dense<0.000000e+00> : vector<8x300xf32>
    %11 = tpu.matmul %9, %10, %cst_8 {dimension_numbers = #tpu.dot_dimension_numbers<[1], [0], [0], [1], [0, 0, 1, 1], [], []>} : vector<8x400xbf16>, vector<400x300xbf16>, vector<8x300xf32> -> vector<8x300xf32>
    %c0_9 = arith.constant 0 : index
    %c0_10 = arith.constant 0 : index
    %12 = vector.load %arg5[%c0_9, %c0_10] : memref<1x300xf32, #tpu.memory_space<vmem>>, vector<1x300xf32>
    %13 = vector.broadcast %12 : vector<1x300xf32> to vector<8x300xf32>
    %14 = arith.addf %11, %13 : vector<8x300xf32>
    %cst_11 = arith.constant 0.000000e+00 : f32
    %15 = vector.broadcast %cst_11 : f32 to vector<8x300xf32>
    %16 = arith.maximumf %14, %15 : vector<8x300xf32>
    %17 = arith.truncf %16 : vector<8x300xf32> to vector<8x300xbf16>
    %c0_12 = arith.constant 0 : index
    %c0_13 = arith.constant 0 : index
    %18 = vector.load %arg6[%c0_12, %c0_13] : memref<300x4xbf16, #tpu.memory_space<vmem>>, vector<300x4xbf16>
    %cst_14 = arith.constant dense<0.000000e+00> : vector<8x4xf32>
    %19 = tpu.matmul %17, %18, %cst_14 {dimension_numbers = #tpu.dot_dimension_numbers<[1], [0], [0], [1], [0, 0, 1, 1], [], []>} : vector<8x300xbf16>, vector<300x4xbf16>, vector<8x4xf32> -> vector<8x4xf32>
    %c0_15 = arith.constant 0 : index
    %c0_16 = arith.constant 0 : index
    %20 = vector.load %arg7[%c0_15, %c0_16] : memref<1x4xf32, #tpu.memory_space<vmem>>, vector<1x4xf32>
    %21 = vector.broadcast %20 : vector<1x4xf32> to vector<8x4xf32>
    %22 = arith.addf %19, %21 : vector<8x4xf32>
    %23 = math.tanh %22 : vector<8x4xf32>
    %c0_17 = arith.constant 0 : index
    %c0_18 = arith.constant 0 : index
    %24 = vector.load %arg8[%c0_17, %c0_18] : memref<8x4xf32, #tpu.memory_space<vmem>>, vector<8x4xf32>
    tpu.vector_store %arg8[%c0_17, %c0_18], %23 {strides = array<i32>} : memref<8x4xf32, #tpu.memory_space<vmem>>, vector<8x4xf32>,
    return
  }
  func.func @transform_0(%arg0: i32) -> (i32, i32) {
    %c0_i32 = arith.constant 0 : i32
    %c0_i32_0 = arith.constant 0 : i32
    return %arg0, %c0_i32 : i32, i32
  }
  func.func @transform_1(%arg0: i32) -> (i32, i32) {
    %c0_i32 = arith.constant 0 : i32
    %c0_i32_0 = arith.constant 0 : i32
    %c0_i32_1 = arith.constant 0 : i32
    return %c0_i32, %c0_i32_0 : i32, i32
  }
  func.func @transform_2(%arg0: i32) -> (i32, i32) {
    %c0_i32 = arith.constant 0 : i32
    %c0_i32_0 = arith.constant 0 : i32
    %c0_i32_1 = arith.constant 0 : i32
    return %c0_i32, %c0_i32_0 : i32, i32
  }
  func.func @transform_3(%arg0: i32) -> (i32, i32) {
    %c0_i32 = arith.constant 0 : i32
    %c0_i32_0 = arith.constant 0 : i32
    %c0_i32_1 = arith.constant 0 : i32
    return %c0_i32, %c0_i32_0 : i32, i32
  }
  func.func @transform_4(%arg0: i32) -> (i32, i32) {
    %c0_i32 = arith.constant 0 : i32
    %c0_i32_0 = arith.constant 0 : i32
    %c0_i32_1 = arith.constant 0 : i32
    return %c0_i32, %c0_i32_0 : i32, i32
  }
  func.func @transform_5(%arg0: i32) -> (i32, i32) {
    %c0_i32 = arith.constant 0 : i32
    %c0_i32_0 = arith.constant 0 : i32
    %c0_i32_1 = arith.constant 0 : i32
    return %c0_i32, %c0_i32_0 : i32, i32
  }
  func.func @transform_6(%arg0: i32) -> (i32, i32) {
    %c0_i32 = arith.constant 0 : i32
    %c0_i32_0 = arith.constant 0 : i32
    %c0_i32_1 = arith.constant 0 : i32
    return %c0_i32, %c0_i32_0 : i32, i32
  }
  func.func @transform_7(%arg0: i32) -> (i32, i32) {
    %c0_i32 = arith.constant 0 : i32
    %c0_i32_0 = arith.constant 0 : i32
    return %arg0, %c0_i32 : i32, i32
  }
}

</mosaic_0001>

<bundles_post_ra>
// kernel: tpu_custom_call.1
= control target key start
LH: loop header
LB: loop body
LE: loop exit
PB: predicated region body
PF: predicated region fallthrough
CT: control target
= control target key end

     0   :  { %12 = vsyncpa [#allocation3], 0  ;;  %s1771_s0 = inlined_call_operand.vmem [shape: f32[2,33], index: 0, kind: input, shape index: {}]   ;;  %s1772_s1 = inlined_call_operand.vmem [shape: bf16[33,400], index: 1, kind: input, shape index: {}]   ;;  %s1773_s2 = inlined_call_operand.vmem [shape: f32[1,400], index: 2, kind: input, shape index: {}]   ;;  %s1774_s3 = inlined_call_operand.hbm [shape: bf16[400,300], index: 3, kind: input, shape index: {}]   ;;  %s1775_s4 = inlined_call_operand.vmem [shape: f32[1,300], index: 4, kind: input, shape index: {}]   ;;  %s1776_s5 = inlined_call_operand.vmem [shape: bf16[300,4], index: 5, kind: input, shape index: {}]   ;;  %s1777_s6 = inlined_call_operand.vmem [shape: f32[1,4], index: 6, kind: input, shape index: {}]   ;;  %s1778_s7 = inlined_call_operand.hbm [shape: f32[2,4], index: 7, kind: output, shape index: {}]  }
   0x1   :  { %13 = vsyncpa [#allocation4], 0  ;;  %s1560_s24 = smov [#allocation2]   ;;  %s1512_s28 = scalar_lea.hbm %s1774_s3, 9600 }
   0x2   :  { %s25_s25 = sshll.u32 %s1560_s24, 4  ;;  %p1513_p0 = scmp.ne.s32.totalorder %s1774_s3, %s1512_s28  ;;  %s26_s25 = int_to_ptr.vmem [resolvable:$true] %s25_s25 }
   0x3   :  { %p1516_p1 = scmp.lt.u32.totalorder %s1512_s28, %s1774_s3 }
   0x5   :  { %p1518_p2 = pnand %p1516_p1, %p1513_p0 }
   0x7   :  { %1521 = shalt.err (!%p1518_p2)
}
   0x8   :  { %s1522_s10 = scalar_lea.vmem %s26_s25, 9600  ;;  %p1527_p4 = scmp.lt.s32.totalorder %s26_s25, %s26_s25 }
   0x9   :  { %p1523_p3 = scmp.ne.s32.totalorder %s26_s25, %s1522_s10  ;;  %p1528_p5 = scmp.lt.s32.totalorder %s1522_s10, %s1522_s10 }
   0xb   :  { %p1529_p6 = por %p1528_p5, %p1527_p4 }
   0xd   :  { %p1530_p7 = pnand %p1529_p6, %p1523_p3 }
   0xf   :  { %1533 = shalt.err (!%p1530_p7)
}
  0x10   :  { %s1561_s11 = smov 192   ;;  %s1562_s12 = smov 12  }
  0x11   :  { %31 = dma.hbm_to_vmem [thread:$0]  %s1774_s3, 9600, %s26_s25, [#allocation3], %s1561_s11, %s1561_s11, %s1562_s12  }
  0x12   :  { %1556 = dma.done.wait [#allocation3], 9600  }
  0x13   :  { %1557 = vsyncadd [#allocation3], 4294957696  ;;  %v1563_v0 = vmov 0   ;;  %vm130_vm0 = vcmask 1040384   ;;  %v1375_v1 = vld [vmem:[%s1772_s1 + $0x4] ss:$16 sps:$4 sm:$0xff]  }
  0x14   :  { %177 = vmatprep.mubr.bf16.mxu0 %v1563_v0  ;;  %218 = vmatprep.mubr.bf16.mxu1 %v1563_v0  ;;  %v1377_v2 = vld [vmem:[%s1772_s1] ss:$16 sps:$4 sm:$0xff]   ;;  %v1378_v3 = vld [vmem:[%s1772_s1 + $0x24] ss:$16 sps:$4 sm:$0xff]   ;;  %v132_v5 = vsel %vm130_vm0, 65535, %v1563_v0  ;;  %vm126_vm1 = vcmask 269312  }
  0x15   :  { %145 = vmatprep.subr.bf16.mxu0 %v1375_v1  ;;  %v52_v4 = vld [vmem:[%s1772_s1 + $0x40] sm:$0x11]  ;;  %v1383_v9 = vld [vmem:[%s1772_s1 + $0xc] ss:$16 sps:$4 sm:$0xff]   ;;  %v1385_v10 = vld [vmem:[%s1772_s1 + $0x8] ss:$16 sps:$4 sm:$0xff]  }
  0x16   :  { %146 = vmatpush1.bf16.msra.mxu0 %v1377_v2  ;;  %v1380_v6 = vld [vmem:[%s1772_s1 + $0x20] ss:$16 sps:$4 sm:$0xff]   ;;  %v1199_v7 = vcombine.high %v52_v4, %v52_v4  ;;  %v1198_v8 = vcombine.low %v52_v4, %v52_v4  ;;  %v1386_v12 = vld [vmem:[%s1772_s1 + $0x2c] ss:$16 sps:$4 sm:$0xff]   ;;  %186 = vmatprep.subr.bf16.mxu1 %v1383_v9  ;;  %v1388_v16 = vld [vmem:[%s1772_s1 + $0x28] ss:$16 sps:$4 sm:$0xff]  }
  0x17   :  { %147 = vmatprep.subr.bf16.mxu0 %v1378_v3  ;;  %v53_v13 = vld [vmem:[%s1772_s1 + $0x48] sm:$0x11]  ;;  %v42_v15 = vld [vmem:[%s1771_s0] sm:$0xff]  ;;  %187 = vmatpush1.bf16.msra.mxu1 %v1385_v10  ;;  %v1397_v27 = vld [vmem:[#allocation2 + $0x30] ss:$12 sps:$4 sm:$0xff]   ;;  %vm752_vm2 = vcmask 130048  }
  0x18   :  { %v137_v11 = vand.u32 %v1199_v7, %v132_v5  ;;  %v134_v14 = vand.u32 %v1198_v8, %v132_v5  ;;  %v1201_v17 = vcombine.high %v53_v13, %v53_v13  ;;  %v1200_v18 = vcombine.low %v53_v13, %v53_v13  ;;  %188 = vmatprep.subr.bf16.mxu1 %v1386_v12  ;;  %v1393_v19 = vld [vmem:[#allocation2 + $0x4] ss:$12 sps:$4 sm:$0xff]   ;;  %v1391_v23 = vld [vmem:[#allocation2] ss:$12 sps:$4 sm:$0xff]   ;;  %v1396_v24 = vld [vmem:[#allocation2 + $0x1c] ss:$12 sps:$4 sm:$0xff]  }
  0x19   :  { %v43_v21 = vpack.c.bf16 %v42_v15, %v42_v15  ;;  %v1394_v25 = vld [vmem:[#allocation2 + $0x18] ss:$12 sps:$4 sm:$0xff]   ;;  %v1399_v26 = vld [vmem:[#allocation2 + $0x34] ss:$12 sps:$4 sm:$0xff]   ;;  %v1408_v38 = vld [vmem:[#allocation2 + $0x7c] ss:$12 sps:$4 sm:$0xff]   ;;  %v56_v8 = vlaneseq }
  0x1a   :  { %148 = vmatpush1.bf16.msra.mxu0 %v1380_v6  ;;  %v143_v20 = vand.u32 %v1201_v17, %v132_v5  ;;  %v140_v22 = vand.u32 %v1200_v18, %v132_v5  ;;  %v1402_v28 = vld [vmem:[#allocation2 + $0x4c] ss:$12 sps:$4 sm:$0xff]   ;;  %v1418_v29 = vld [vmem:[#allocation2 + $0xc8] ss:$12 sps:$4 sm:$0xff]   ;;  %v1405_v34 = vld [vmem:[#allocation2 + $0x64] ss:$12 sps:$4 sm:$0xff]  }
  0x1b   :  { %149 = vmatprep.subr.bf16.mxu0 %v137_v11  ;;  %189 = vmatpush1.bf16.msra.mxu1 %v1388_v16  ;;  %v1419_v30 = vld [vmem:[#allocation2 + $0x8] ss:$12 sps:$4 sm:$0xff]   ;;  %v1423_v32 = vld [vmem:[#allocation2 + $0xe0] ss:$12 sps:$4 sm:$0xff]   ;;  %v1428_v35 = vld [vmem:[#allocation2 + $0xf8] ss:$12 sps:$4 sm:$0xff]  }
  0x1c   :  { %190 = vmatprep.subr.bf16.mxu1 %v143_v20  ;;  %v1400_v31 = vld [vmem:[#allocation2 + $0x48] ss:$12 sps:$4 sm:$0xff]   ;;  %v1424_v33 = vld [vmem:[#allocation2 + $0x20] ss:$12 sps:$4 sm:$0xff]   ;;  %v1429_v36 = vld [vmem:[#allocation2 + $0x38] ss:$12 sps:$4 sm:$0xff]  }
  0x1d   :  { %v1403_v37 = vld [vmem:[#allocation2 + $0x60] ss:$12 sps:$4 sm:$0xff]   ;;  %v1433_v39 = vld [vmem:[#allocation2 + $0x110] ss:$12 sps:$4 sm:$0xff]   ;;  %v1406_v41 = vld [vmem:[#allocation2 + $0x78] ss:$12 sps:$4 sm:$0xff]  }
  0x1e   :  { %150 = vmatpush1.bf16.msra.mxu0 %v134_v14  ;;  %v1434_v40 = vld [vmem:[#allocation2 + $0x50] ss:$12 sps:$4 sm:$0xff]   ;;  %v1411_v42 = vld [vmem:[#allocation2 + $0x94] ss:$12 sps:$4 sm:$0xff]   ;;  %v1414_v47 = vld [vmem:[#allocation2 + $0xac] ss:$12 sps:$4 sm:$0xff]  }
  0x1f   :  { %756 = vmatprep.subr.bf16.mxu0 %v1393_v19  ;;  %191 = vmatpush1.bf16.msra.mxu1 %v140_v22  ;;  %v1438_v43 = vld [vmem:[#allocation2 + $0x128] ss:$12 sps:$4 sm:$0xff]   ;;  %v1409_v44 = vld [vmem:[#allocation2 + $0x90] ss:$12 sps:$4 sm:$0xff]   ;;  %v1443_v46 = vld [vmem:[#allocation2 + $0x140] ss:$12 sps:$4 sm:$0xff]  }
  0x20   :  { %1302 = vmatprep.subr.bf16.mxu1 %v1418_v29  ;;  %v1439_v45 = vld [vmem:[#allocation2 + $0x68] ss:$12 sps:$4 sm:$0xff]   ;;  %v1444_v49 = vld [vmem:[#allocation2 + $0x80] ss:$12 sps:$4 sm:$0xff]   ;;  %v1417_v50 = vld [vmem:[#allocation2 + $0xc4] ss:$12 sps:$4 sm:$0xff]  }
  0x21   :  { %1202 = vmatmul.mubr.msk.bf16.vlgmr.msra.gmra.mrb[0].mxu0 %vm126_vm1, %v43_v21  ;;  %v1412_v48 = vld [vmem:[#allocation2 + $0xa8] ss:$12 sps:$4 sm:$0xff]   ;;  %v1415_v51 = vld [vmem:[#allocation2 + $0xc0] ss:$12 sps:$4 sm:$0xff]   ;;  %v1420_v53 = vld [vmem:[#allocation2 + $0xd8] ss:$12 sps:$4 sm:$0xff]  }
  0x22   :  { %757 = vmatpush1.bf16.msra.mxu0 %v1391_v23  ;;  %1203 = vmatmul.mubr.msk.bf16.vlgmr.msra.gmra.mrb[0].mxu1 %vm126_vm1, %v43_v21  ;;  %v1422_v52 = vld [vmem:[#allocation2 + $0xdc] ss:$12 sps:$4 sm:$0xff]   ;;  %v1427_v54 = vld [vmem:[#allocation2 + $0xf4] ss:$12 sps:$4 sm:$0xff]   ;;  %v1432_v56 = vld [vmem:[#allocation2 + $0x10c] ss:$12 sps:$4 sm:$0xff]  }
  0x23   :  { %758 = vmatprep.subr.bf16.mxu0 %v1396_v24  ;;  %1303 = vmatpush3.bf16.msra.mxu1 %v1419_v30  ;;  %v1425_v55 = vld [vmem:[#allocation2 + $0xf0] ss:$12 sps:$4 sm:$0xff]   ;;  %v1430_v57 = vld [vmem:[#allocation2 + $0x108] ss:$12 sps:$4 sm:$0xff]   ;;  %v1435_v59 = vld [vmem:[#allocation2 + $0x120] ss:$12 sps:$4 sm:$0xff]  }
  0x24   :  { %1304 = vmatprep.subr.bf16.mxu1 %v1423_v32  ;;  %v1437_v58 = vld [vmem:[#allocation2 + $0x124] ss:$12 sps:$4 sm:$0xff]   ;;  %v1442_v60 = vld [vmem:[#allocation2 + $0x13c] ss:$12 sps:$4 sm:$0xff]   ;;  %v1447_v62 = vld [vmem:[#allocation2 + $0x154] ss:$12 sps:$4 sm:$0xff]  }
  0x25   :  { %v1440_v61 = vld [vmem:[#allocation2 + $0x138] ss:$12 sps:$4 sm:$0xff]   ;;  %v1445_v1 = vld [vmem:[#allocation2 + $0x150] ss:$12 sps:$4 sm:$0xff]   ;;  %v1450_v5 = vld [vmem:[#allocation2 + $0x168] ss:$12 sps:$4 sm:$0xff]  }
  0x26   :  { %759 = vmatpush1.bf16.msra.mxu0 %v1394_v25  ;;  %v1448_v63 = vld [vmem:[#allocation2 + $0x158] ss:$12 sps:$4 sm:$0xff]   ;;  %v1453_v4 = vld [vmem:[#allocation2 + $0x170] ss:$12 sps:$4 sm:$0xff]   ;;  %v1658_v9 = vshrl.u32 %v56_v8, 7  ;;  %vm1086_vm3 = vcmask 1045504  }
  0x27   :  { %760 = vmatprep.subr.bf16.mxu0 %v1399_v26  ;;  %1305 = vmatpush3.bf16.msra.mxu1 %v1424_v33  ;;  %v1449_v2 = vld [vmem:[#allocation2 + $0x98] ss:$12 sps:$4 sm:$0xff]   ;;  %v1454_v6 = vld [vmem:[#allocation2 + $0xb0] ss:$12 sps:$4 sm:$0xff]   ;;  %v1664_v11 = vld [vmem:[%s1773_s2] sm:$0xf] }
  0x28   :  { %1306 = vmatprep.subr.bf16.mxu1 %v1428_v35  ;;  %v1452_v3 = vld [vmem:[#allocation2 + $0x16c] ss:$12 sps:$4 sm:$0xff]   ;;  %v1457_v7 = vld [vmem:[#allocation2 + $0x184] ss:$12 sps:$4 sm:$0xff]   ;;  %v58_v10 = vsub.s32 0, %v1658_v9  ;;  %v62_v12 = vsub.s32 1, %v1658_v9 }
  0x29   :  { %v70_v15 = vsub.s32 3, %v1658_v9  ;;  %v1458_v29 = vld [vmem:[#allocation2 + $0x188] ss:$12 sps:$4 sm:$0xff]   ;;  %vm1565_vm4 = vmmov 0   ;;  %vm1082_vm5 = vcmask 359424   ;;  %vm1171_vm6 = vcmask 31744  }
  0x2a   :  { %761 = vmatpush1.bf16.msra.mxu0 %v1397_v27  ;;  %v59_v13 = vrot.slane %v1664_v11, %v58_v10  ;;  %v63_v14 = vrot.slane %v1664_v11, %v62_v12  ;;  %v1461_v33 = vld [vmem:[#allocation2 + $0x19c] ss:$12 sps:$4 sm:$0xff]   ;;  %v1496_v8 = vld [vmem:[%s1776_s5 + $0x10] sm:$0xff]  }
  0x2b   :  { %762 = vmatprep.subr.bf16.mxu0 %v1402_v28  ;;  %1307 = vmatpush3.bf16.msra.mxu1 %v1429_v36  ;;  %v71_v21 = vrot.slane %v1664_v11, %v70_v15  ;;  %v1455_v28 = vld [vmem:[#allocation2 + $0x180] ss:$12 sps:$4 sm:$0xff]   ;;  %v1459_v36 = vld [vmem:[#allocation2 + $0x198] ss:$12 sps:$4 sm:$0xff]  }
  0x2c   :  { %1308 = vmatprep.subr.bf16.mxu1 %v1433_v39  ;;  %v1465_v39 = vld [vmem:[#allocation2 + $0x1b4] ss:$12 sps:$4 sm:$0xff]  }
  0x2d   :  { %v1500_v15 = vld [vmem:[%s1776_s5 + $0x20] sm:$0xff]  }
  0x2e   :  { %763 = vmatpush1.bf16.msra.mxu0 %v1400_v31 }
  0x2f   :  { %764 = vmatprep.subr.bf16.mxu0 %v1405_v34  ;;  %1309 = vmatpush3.bf16.msra.mxu1 %v1434_v40  ;;  %v1463_v40 = vld [vmem:[#allocation2 + $0x1b0] ss:$12 sps:$4 sm:$0xff]  }
  0x30   :  { %1310 = vmatprep.subr.bf16.mxu1 %v1438_v43  ;;  %v1467_v43 = vld [vmem:[#allocation2 + $0x1c8] ss:$12 sps:$4 sm:$0xff]  }
  0x32   :  { %765 = vmatpush1.bf16.msra.mxu0 %v1403_v37  ;;  %v1462_v37 = vld [vmem:[#allocation2 + $0x1a0] ss:$12 sps:$4 sm:$0xff]  }
  0x33   :  { %766 = vmatprep.subr.bf16.mxu0 %v1408_v38  ;;  %1311 = vmatpush3.bf16.msra.mxu1 %v1439_v45  ;;  %v1473_v45 = vld [vmem:[#allocation2 + $0x1e4] ss:$12 sps:$4 sm:$0xff]  }
  0x34   :  { %1312 = vmatprep.subr.bf16.mxu1 %v1443_v46  ;;  %v1471_v46 = vld [vmem:[#allocation2 + $0x1e0] ss:$12 sps:$4 sm:$0xff]  }
  0x36   :  { %767 = vmatpush1.bf16.msra.mxu0 %v1406_v41  ;;  %v1466_v41 = vld [vmem:[#allocation2 + $0x1b8] ss:$12 sps:$4 sm:$0xff]  }
  0x37   :  { %768 = vmatprep.subr.bf16.mxu0 %v1411_v42  ;;  %1313 = vmatpush3.bf16.msra.mxu1 %v1444_v49  ;;  %v1469_v42 = vld [vmem:[#allocation2 + $0x1cc] ss:$12 sps:$4 sm:$0xff]  }
  0x38   :  { %1314 = vmatprep.subr.bf16.mxu1 %v1448_v63  ;;  %v1475_v49 = vld [vmem:[#allocation2 + $0x1f8] ss:$12 sps:$4 sm:$0xff]  }
  0x3a   :  { %769 = vmatpush1.bf16.msra.mxu0 %v1409_v44  ;;  %v1470_v44 = vld [vmem:[#allocation2 + $0x1d0] ss:$12 sps:$4 sm:$0xff]  }
  0x3b   :  { %770 = vmatprep.subr.bf16.mxu0 %v1414_v47  ;;  %1315 = vmatpush3.bf16.msra.mxu1 %v1449_v2  ;;  %v1474_v47 = vld [vmem:[#allocation2 + $0x1e8] ss:$12 sps:$4 sm:$0xff]   ;;  %v1491_v2 = vld [vmem:[%s1776_s5 + $0x40] sm:$0xff]  }
  0x3c   :  { %1316 = vmatprep.subr.bf16.mxu1 %v1453_v4  ;;  %v1493_v4 = vld [vmem:[%s1776_s5 + $0x48] sm:$0xff]  }
  0x3e   :  { %771 = vmatpush1.bf16.msra.mxu0 %v1412_v48  ;;  %v1477_v48 = vld [vmem:[#allocation2 + $0x1fc] ss:$12 sps:$4 sm:$0xff]  }
  0x3f   :  { %772 = vmatprep.subr.bf16.mxu0 %v1417_v50  ;;  %1317 = vmatpush3.bf16.msra.mxu1 %v1454_v6  ;;  %v1478_v50 = vld [vmem:[#allocation2 + $0x200] ss:$12 sps:$4 sm:$0xff]  }
  0x40   :  { %878 = vmatprep.subr.bf16.mxu1 %v1563_v0  ;;  %v1501_v6 = vld [vmem:[%s1776_s5 + $0x80] sm:$0xff]  }
  0x42   :  { %773 = vmatpush1.bf16.msra.mxu0 %v1415_v51  ;;  %v66_v51 = vsub.s32 2, %v1658_v9 }
  0x43   :  { %774 = vmatprep.subr.bf16.mxu0 %v1422_v52  ;;  %v1481_v52 = vld [vmem:[#allocation2 + $0x214] ss:$12 sps:$4 sm:$0xff]  }
  0x46   :  { %775 = vmatpush1.bf16.msra.mxu0 %v1420_v53  ;;  %v1479_v53 = vld [vmem:[#allocation2 + $0x210] ss:$12 sps:$4 sm:$0xff]  }
  0x47   :  { %776 = vmatprep.subr.bf16.mxu0 %v1427_v54  ;;  %v1482_v54 = vld [vmem:[#allocation2 + $0x218] ss:$12 sps:$4 sm:$0xff]  }
  0x4a   :  { %777 = vmatpush1.bf16.msra.mxu0 %v1425_v55  ;;  %v67_v55 = vrot.slane %v1664_v11, %v66_v51  ;;  %v1497_v11 = vld [vmem:[%s1776_s5 + $0x58] sm:$0xff]  }
  0x4b   :  { %778 = vmatprep.subr.bf16.mxu0 %v1432_v56  ;;  %v1485_v56 = vld [vmem:[#allocation2 + $0x22c] ss:$12 sps:$4 sm:$0xff]  }
  0x4e   :  { %779 = vmatpush1.bf16.msra.mxu0 %v1430_v57  ;;  %v1483_v57 = vld [vmem:[#allocation2 + $0x228] ss:$12 sps:$4 sm:$0xff]  }
  0x4f   :  { %780 = vmatprep.subr.bf16.mxu0 %v1437_v58  ;;  %v1486_v58 = vld [vmem:[#allocation2 + $0x230] ss:$12 sps:$4 sm:$0xff]  }
  0x52   :  { %781 = vmatpush1.bf16.msra.mxu0 %v1435_v59 }
  0x53   :  { %782 = vmatprep.subr.bf16.mxu0 %v1442_v60  ;;  %v1489_v60 = vld [vmem:[#allocation2 + $0x244] ss:$12 sps:$4 sm:$0xff]  }
  0x56   :  { %783 = vmatpush1.bf16.msra.mxu0 %v1440_v61  ;;  %v1487_v61 = vld [vmem:[#allocation2 + $0x240] ss:$12 sps:$4 sm:$0xff]  }
  0x57   :  { %784 = vmatprep.subr.bf16.mxu0 %v1447_v62  ;;  %v1490_v62 = vld [vmem:[#allocation2 + $0x248] ss:$12 sps:$4 sm:$0xff]  }
  0x5a   :  { %785 = vmatpush1.bf16.msra.mxu0 %v1445_v1 }
  0x5b   :  { %786 = vmatprep.subr.bf16.mxu0 %v1452_v3  ;;  %v1492_v3 = vld [vmem:[%s1776_s5] sm:$0xff]  }
  0x5e   :  { %787 = vmatpush1.bf16.msra.mxu0 %v1450_v5  ;;  %v1564_v5 = vmov 0.0  }
  0x5f   :  { %797 = vmatprep.subr.bf16.mxu0 %v1457_v7  ;;  %v1495_v7 = vld [vmem:[%s1776_s5 + $0x50] sm:$0xff]  }
  0xf4   :  { %v179_v16 = vpop.f32.mrb[0].mxu0 }
  0xf5   :  { %v180_v17 = vadd.f32 %v179_v16, %v59_v13  ;;  %v181_v18 = vpop.f32.mrb[1].mxu0  ;;  %v1675_v25 = vpop.f32.mrb[0].mxu1  ;;  %v1498_v13 = vld [vmem:[%s1776_s5 + $0x18] sm:$0xff]   ;;  %v1502_v16 = vld [vmem:[%s1776_s5 + $0x68] sm:$0xff]  }
  0xf6   :  { %v182_v19 = vadd.f32 %v181_v18, %v63_v14  ;;  %v183_v20 = vpop.f32.mrb[2].mxu0  ;;  %v222_v26 = vpop.f32.mrb[1].mxu1  ;;  %v221_v59 = vadd.f32 %v1675_v25, %v67_v55  ;;  %v1499_v14 = vld [vmem:[%s1776_s5 + $0x60] sm:$0xff]   ;;  %v1504_v18 = vld [vmem:[%s1776_s5 + $0x88] sm:$0xff]  }
  0xf7   :  { %v227_v22 = vmax.f32 %v180_v17, 0.0  ;;  %v184_v23 = vpop.f32.mrb[3].mxu0  ;;  %v223_v30 = vadd.f32 %v222_v26, %v71_v21  ;;  %v224_v31 = vpop.f32.mrb[2].mxu1  ;;  %v1503_v17 = vld [vmem:[%s1776_s5 + $0x28] sm:$0xff]   ;;  %v1506_v20 = vld [vmem:[%s1776_s5 + $0x30] sm:$0xff]  }
  0xf8   :  { %v228_v24 = vmax.f32 %v182_v19, 0.0  ;;  %v225_v34 = vpop.f32.mrb[3].mxu1  ;;  %v229_v63 = vmax.f32 %v221_v59, 0.0  ;;  %v1505_v19 = vld [vmem:[%s1776_s5 + $0x70] sm:$0xff]   ;;  %v1508_v23 = vld [vmem:[%s1776_s5 + $0x78] sm:$0xff]  }
  0xf9   :  { %v231_v32 = vpack.c.bf16 %v227_v22, %v227_v22  ;;  %v230_v35 = vmax.f32 %v223_v30, 0.0  ;;  %v1507_v21 = vld [vmem:[%s1776_s5 + $0x90] sm:$0x3f]   ;;  %v335_v30 = vld [vmem:[%s1775_s4] sm:$0x7] }
  0xfa   :  { %v232_v27 = vpack.c.bf16 %v228_v24, %v228_v24  ;;  %v233_v1 = vpack.c.bf16 %v229_v63, %v229_v63  ;;  %v1088_v22 = vsel %vm1086_vm3, %v1507_v21, 0  ;;  %v1509_v24 = vld [vmem:[%s1776_s5 + $0x38] sm:$0xff]   ;;  %v348_v31 = vrot.slane %v335_v30, %v66_v51 }
  0xfb   :  { %v234_v38 = vpack.c.bf16 %v230_v35, %v230_v35 }
  0xfc   :  { %788 = vmatprep.mubr.bf16.mxu0 %v232_v27  ;;  %870 = vmatprep.mubr.bf16.mxu1 %v232_v27 }
  0xfd   :  { %789 = vmatmul.mubr.bf16.vlgmr.msra.gmra.mrb[4].mxu0 %v231_v32  ;;  %871 = vmatmul.mubr.bf16.vlgmr.msra.gmra.mrb[4].mxu1 %v231_v32  ;;  %v340_v32 = vrot.slane %v335_v30, %v58_v10 }
  0xfe   :  { %798 = vmatpush1.bf16.msra.mxu0 %v1455_v28  ;;  %879 = vmatpush1.bf16.msra.mxu1 %v1458_v29 }
  0xff   :  { %799 = vmatprep.subr.bf16.mxu0 %v1461_v33  ;;  %880 = vmatprep.subr.bf16.mxu1 %v1563_v0  ;;  %v344_v33 = vrot.slane %v335_v30, %v62_v12 }
 0x100   :  { %1279 = vmatprep.mubr.msk.bf16.mxu0 %vm752_vm2, %v234_v38  ;;  %1280 = vmatprep.mubr.msk.bf16.mxu1 %vm752_vm2, %v234_v38 }
 0x102   :  { %800 = vmatpush1.bf16.msra.mxu0 %v1459_v36  ;;  %881 = vmatpush1.bf16.msra.mxu1 %v1462_v37 }
 0x103   :  { %801 = vmatprep.subr.bf16.mxu0 %v1465_v39  ;;  %882 = vmatprep.subr.bf16.mxu1 %v1563_v0 }
 0x106   :  { %802 = vmatpush1.bf16.msra.mxu0 %v1463_v40  ;;  %883 = vmatpush1.bf16.msra.mxu1 %v1466_v41 }
 0x107   :  { %803 = vmatprep.subr.bf16.mxu0 %v1469_v42  ;;  %884 = vmatprep.subr.bf16.mxu1 %v1563_v0 }
 0x10a   :  { %804 = vmatpush1.bf16.msra.mxu0 %v1467_v43  ;;  %885 = vmatpush1.bf16.msra.mxu1 %v1470_v44 }
 0x10b   :  { %805 = vmatprep.subr.bf16.mxu0 %v1473_v45  ;;  %886 = vmatprep.subr.bf16.mxu1 %v1563_v0 }
 0x10e   :  { %806 = vmatpush1.bf16.msra.mxu0 %v1471_v46  ;;  %887 = vmatpush1.bf16.msra.mxu1 %v1474_v47 }
 0x10f   :  { %807 = vmatprep.subr.bf16.mxu0 %v1477_v48  ;;  %888 = vmatprep.subr.bf16.mxu1 %v1563_v0 }
 0x112   :  { %808 = vmatpush1.bf16.msra.mxu0 %v1475_v49  ;;  %889 = vmatpush1.bf16.msra.mxu1 %v1478_v50 }
 0x113   :  { %809 = vmatprep.subr.bf16.mxu0 %v1481_v52  ;;  %890 = vmatprep.subr.bf16.mxu1 %v1563_v0 }
 0x116   :  { %810 = vmatpush1.bf16.msra.mxu0 %v1479_v53  ;;  %891 = vmatpush1.bf16.msra.mxu1 %v1482_v54  ;;  %v1281_v53 = vld [vmem:[%s1777_s6] ss:$0 sm:$0xff] }
 0x117   :  { %811 = vmatprep.subr.bf16.mxu0 %v1485_v56  ;;  %892 = vmatprep.subr.bf16.mxu1 %v1563_v0 }
 0x11a   :  { %812 = vmatpush1.bf16.msra.mxu0 %v1483_v57  ;;  %893 = vmatpush1.bf16.msra.mxu1 %v1486_v58 }
 0x11b   :  { %813 = vmatprep.subr.bf16.mxu0 %v1489_v60  ;;  %894 = vmatprep.subr.bf16.mxu1 %v1563_v0  ;;  %v1494_v0 = vld [vmem:[%s1776_s5 + $0x8] sm:$0xff]  }
 0x11e   :  { %814 = vmatpush1.bf16.msra.mxu0 %v1487_v61  ;;  %895 = vmatpush1.bf16.msra.mxu1 %v1490_v62 }
 0x11f   :  { %1350 = vmatprep.subr.bf16.mxu0 %v1564_v5  ;;  %1324 = vmatprep.subr.bf16.mxu1 %v1491_v2 }
 0x121   :  { %830 = vmatmul.mubr.bf16.vlgmr.msra.gmra.mrb[4].mxu0 %v233_v1  ;;  %911 = vmatmul.mubr.bf16.vlgmr.msra.gmra.mrb[8].mxu1 %v233_v1 }
 0x122   :  { %1325 = vmatpush3.bf16.msra.mxu1 %v1492_v3  ;;  %1351 = vmatpush3.bf16.msra.mxu0 %v1501_v6 }
 0x123   :  { %1326 = vmatprep.subr.bf16.mxu1 %v1493_v4  ;;  %1352 = vmatprep.subr.bf16.mxu0 %v1564_v5 }
 0x124   :  { %1356 = vmatprep.mubr.msk.bf16.mxu0 %vm1565_vm4, %v1564_v5 }
 0x126   :  { %1327 = vmatpush3.bf16.msra.mxu1 %v1494_v0  ;;  %1353 = vmatpush3.bf16.msra.mxu0 %v1504_v18 }
 0x127   :  { %1328 = vmatprep.subr.bf16.mxu1 %v1495_v7  ;;  %1354 = vmatprep.subr.bf16.mxu0 %v1564_v5 }
 0x12a   :  { %1329 = vmatpush3.bf16.msra.mxu1 %v1496_v8  ;;  %1355 = vmatpush3.bf16.msra.mxu0 %v1088_v22 }
 0x12b   :  { %1330 = vmatprep.subr.bf16.mxu1 %v1497_v11 }
 0x12e   :  { %1331 = vmatpush3.bf16.msra.mxu1 %v1498_v13 }
 0x12f   :  { %1332 = vmatprep.subr.bf16.mxu1 %v1499_v14 }
 0x132   :  { %1333 = vmatpush3.bf16.msra.mxu1 %v1500_v15 }
 0x133   :  { %1334 = vmatprep.subr.bf16.mxu1 %v1502_v16 }
 0x136   :  { %1335 = vmatpush3.bf16.msra.mxu1 %v1503_v17 }
 0x137   :  { %1336 = vmatprep.subr.bf16.mxu1 %v1505_v19 }
 0x13a   :  { %1337 = vmatpush3.bf16.msra.mxu1 %v1506_v20 }
 0x13b   :  { %1338 = vmatprep.subr.bf16.mxu1 %v1508_v23 }
 0x13e   :  { %1339 = vmatpush3.bf16.msra.mxu1 %v1509_v24 }
 0x1d0   :  { %v1318_v25 = vpop.f32.mrb[4].mxu1 }
 0x1d1   :  { %v1319_v26 = vpop.f32.mrb[5].mxu1 }
 0x1d2   :  { %v1320_v27 = vadd.f32 %v1319_v26, %v1318_v25  ;;  %v1321_v28 = vpop.f32.mrb[6].mxu1 }
 0x1d3   :  { %v1322_v29 = vpop.f32.mrb[7].mxu1 }
 0x1d4   :  { %v873_v34 = vadd.f32 %v1320_v27, %v348_v31 }
 0x1f4   :  { %v831_v35 = vpop.f32.mrb[4].mxu0  ;;  %v912_v36 = vpop.f32.mrb[8].mxu1 }
 0x1f5   :  { %v1360_v37 = vadd.f32 %v831_v35, %v340_v32  ;;  %v913_v38 = vadd.f32 %v912_v36, %v873_v34  ;;  %v833_v39 = vpop.f32.mrb[5].mxu0  ;;  %v914_v40 = vpop.f32.mrb[9].mxu1 }
 0x1f6   :  { %v1361_v41 = vadd.f32 %v833_v39, %v344_v33  ;;  %v835_v42 = vpop.f32.mrb[6].mxu0  ;;  %v915_v43 = vpop.f32.mrb[10].mxu1 }
 0x1f7   :  { %v918_v44 = vmax.f32 %v1360_v37, 0.0  ;;  %v920_v45 = vmax.f32 %v913_v38, 0.0  ;;  %v836_v46 = vpop.f32.mrb[7].mxu0  ;;  %v916_v47 = vpop.f32.mrb[11].mxu1 }
 0x1f8   :  { %v919_v48 = vmax.f32 %v1361_v41, 0.0 }
 0x1f9   :  { %v923_v10 = vpack.c.bf16 %v920_v45, %v920_v45  ;;  %v921_v9 = vpack.c.bf16 %v918_v44, %v918_v44 }
 0x1fa   :  { %v922_v49 = vpack.c.bf16 %v919_v48, %v919_v48 }
 0x1fb   :  { %1357 = vmatmul.mubr.msk.bf16.vlgmr.msra.gmra.mrb[8].mxu0 %vm1082_vm5, %v923_v10 }
 0x1fc   :  { %1122 = vmatprep.mubr.bf16.mxu1 %v922_v49 }
 0x1fd   :  { %1123 = vmatmul.mubr.bf16.vlgmr.msra.gmra.mrb[12].mxu1 %v921_v9 }
 0x2ce   :  { %v1164_v12 = vpop.f32.mrb[8].mxu0 }
 0x2cf   :  { %v1358_v50 = vpop.f32.mrb[9].mxu0 }
 0x2d0   :  { %v1340_v51 = vpop.f32.mrb[12].mxu1  ;;  %v1167_v52 = vpop.f32.mrb[10].mxu0 }
 0x2d1   :  { %v1341_v54 = vpop.f32.mrb[13].mxu1  ;;  %v1359_v55 = vpop.f32.mrb[11].mxu0 }
 0x2d2   :  { %v1342_v56 = vadd.f32 %v1341_v54, %v1340_v51  ;;  %v1343_v57 = vpop.f32.mrb[14].mxu1 }
 0x2d3   :  { %v1344_v58 = vpop.f32.mrb[15].mxu1 }
 0x2d4   :  { %v1125_v59 = vadd.f32 %v1342_v56, %v1281_v53 }
 0x2d6   :  { %v1165_v60 = vadd.f32 %v1164_v12, %v1125_v59 }
 0x2d8   :  { %1510 = vtanh.f32 %v1165_v60 }
 0x2e2   :  { %v1511_v61 = vpop.eup %1510 }
 0x2e3   :  { %1172 = vst.msk [vmem:[#allocation5] sm:$0xff] %vm1171_vm6, %v1511_v61 }
 0x2e4   :  { %1177 = vsyncadd [#allocation4], 96  ;;  %s1566_s24 = smov [#allocation5]  }
 0x2e5   :  { %s1178_s25 = sshll.u32 %s1566_s24, 4  ;;  %s1179_s25 = int_to_ptr.vmem [resolvable:$true] %s1178_s25 }
 0x2e6   :  { %s1534_s26 = scalar_lea.vmem %s1179_s25, 32  ;;  %s1538_s27 = scalar_lea.vmem %s1179_s25, 128 }
 0x2e7   :  { %p1535_p8 = scmp.ne.s32.totalorder %s1179_s25, %s1534_s26  ;;  %p1539_p9 = scmp.lt.s32.totalorder %s1179_s25, %s1179_s25 }
 0x2e8   :  { %p1540_p10 = scmp.lt.s32.totalorder %s1538_s27, %s1534_s26 }
 0x2ea   :  { %p1541_p11 = por %p1540_p10, %p1539_p9 }
 0x2ec   :  { %p1542_p12 = pnand %p1541_p11, %p1535_p8 }
 0x2ee   :  { %1545 = shalt.err (!%p1542_p12)
}
 0x2ef   :  { %s1546_s29 = scalar_lea.hbm %s1778_s7, 32 }
 0x2f0   :  { %p1547_p13 = scmp.ne.s32.totalorder %s1778_s7, %s1546_s29  ;;  %p1550_p0 = scmp.lt.u32.totalorder %s1546_s29, %s1778_s7 }
 0x2f2   :  { %p1552_p1 = pnand %p1550_p0, %p1547_p13 }
 0x2f4   :  { %1555 = shalt.err (!%p1552_p1)
}
 0x2f5   :  { %s1567_s11 = smov 32   ;;  %s1568_s12 = smov 2  }
 0x2f6   :  { %1184 = dma.vmem_to_hbm [thread:$0]  %s1179_s25, 32, %s1778_s7, [#allocation4], %s1567_s11, %s1567_s11, %s1568_s12  }
 0x2f7   :  { %1558 = dma.done.wait [#allocation4], 128  }
 0x2f8   :  { %1559 = vsyncadd [#allocation4], 4294967168 }
 0x2f9   :  { %1188 = vsyncpa [#allocation3], 1 }
 0x2fa   :  { %1189 = vsyncpa [#allocation4], 1 }

</bundles_post_ra>
